<compile_context>
chip_gen: v5e
topology: v5e:2x2
jax: 0.10.0
libtpu: 0.0.40
codegen_flags: <defaults>
</compile_context>

<pallas_src>
import jax
import jax.numpy as jnp
from jax.experimental import pallas as pl
from jax.experimental.pallas import tpu as pltpu


def _proj_kernel(x_ref, wT_ref, b_ref, o_ref):
    # x_ref : (1, C_in, TM)   activation tile (NCHW, space flattened onto lanes)
    # wT_ref: (C_out, C_in)   1x1-conv weight, VMEM-resident across the grid
    # b_ref : (C_out, 1)      bias column, VMEM-resident across the grid
    # o_ref : (1, C_out, TM)
    acc = jnp.dot(wT_ref[...], x_ref[0], preferred_element_type=jnp.float32)
    o_ref[0] = (acc + b_ref[...]).astype(o_ref.dtype)


def _choose_tm(M):
    """Lane-dense M tile: full extent when small, else a 1024-lane tile."""
    if M <= 2048:
        return M            # full extent along M is always a legal block dim
    return 1024             # multiple of 128; ragged tail is masked by Pallas


def _proj_matmul(x3, wT, b_col):
    """1x1 conv as a tiled, pipelined matmul.

    x3:    (B, C_in, M)   float32   (NCHW with space flattened)
    wT:    (C_out, C_in)  float32
    b_col: (C_out, 1)     float32
    returns (B, C_out, M) float32
    """
    B, C_in, M = x3.shape
    C_out = wT.shape[0]
    TM = _choose_tm(M)
    grid = (B, pl.cdiv(M, TM))

    cost = pl.CostEstimate(
        flops=2 * B * M * C_in * C_out,
        transcendentals=0,
        bytes_accessed=4 * (B * M * C_in + B * M * C_out + C_in * C_out + C_out),
    )

    return pl.pallas_call(
        _proj_kernel,
        out_shape=jax.ShapeDtypeStruct((B, C_out, M), x3.dtype),
        grid_spec=pltpu.PrefetchScalarGridSpec(
            num_scalar_prefetch=0,
            grid=grid,
            in_specs=[
                # streamed activation tile: (1, C_in, TM)
                pl.BlockSpec((1, C_in, TM), lambda bi, mi: (bi, 0, mi)),
                # weight: full, VMEM-resident across the grid
                pl.BlockSpec((C_out, C_in), lambda bi, mi: (0, 0)),
                # bias column: full, VMEM-resident across the grid
                pl.BlockSpec((C_out, 1), lambda bi, mi: (0, 0)),
            ],
            out_specs=pl.BlockSpec((1, C_out, TM), lambda bi, mi: (bi, 0, mi)),
        ),
        compiler_params=pltpu.CompilerParams(
            dimension_semantics=("parallel", "parallel"),
            vmem_limit_bytes=32 * 1024 * 1024,
        ),
        cost_estimate=cost,
    )(x3, wT, b_col)


def patch_unembed(x, w, b, *, patch_size, out_chans):
    """Forward pass of PatchUnEmbed (kernel_size=None default => 1x1 conv,
    padding=0, reflect pad is a no-op).

    x: (B, embed_dim, H, W)                  NCHW, float32
    w: (embed_dim, out_chans*patch_size**2)  1x1 conv weight, stored (C_in, C_out)
    b: (out_chans*patch_size**2,)            conv bias
    returns: (B, out_chans, H*patch_size, W*patch_size)
    """
    B, C_in, H, W = x.shape
    C_out = out_chans * patch_size ** 2
    assert w.shape == (C_in, C_out)

    M = H * W
    # Free, contiguous reshape (no transpose, no extra HBM pass).
    x3 = x.reshape(B, C_in, M)
    wT = jnp.transpose(w)              # (C_out, C_in) — tiny, done once by XLA
    b_col = b.reshape(C_out, 1)

    # 1x1 conv: (B, C_out, M) already NCHW-major.
    y3 = _proj_matmul(x3, wT, b_col)
    y = y3.reshape(B, C_out, H, W)

    # PixelShuffle(patch_size): (B, C*r*r, H, W) -> (B, C, H*r, W*r).
    # Single XLA layout pass (pure reshape/transpose, no compute).
    r = patch_size
    y = y.reshape(B, out_chans, r, r, H, W)
    y = y.transpose(0, 1, 4, 2, 5, 3)            # (B, C, H, r, W, r)
    y = y.reshape(B, out_chans, H * r, W * r)
    return y


def _reference(x, w, b, *, patch_size, out_chans):
    """Pure-JAX reference for correctness checking."""
    B, C_in, H, W = x.shape
    C_out = out_chans * patch_size ** 2
    y = jnp.einsum('bchw,co->bohw', x, w) + b.reshape(1, C_out, 1, 1)
    r = patch_size
    y = y.reshape(B, out_chans, r, r, H, W).transpose(0, 1, 4, 2, 5, 3)
    return y.reshape(B, out_chans, H * r, W * r)


if __name__ == "__main__":
    # Module hyperparameters (kernel_size=None -> 1x1 conv, reflect pad no-op)
    patch_size = 4
    out_chans = 3
    embed_dim = 32

    B, H, W = 2, 8, 8
    C_out = out_chans * patch_size ** 2  # 48

    key = jax.random.PRNGKey(0)
    kx, kw, kb = jax.random.split(key, 3)

    # Deterministic synthetic parameters
    # (PyTorch Conv2d weight (C_out, C_in, 1, 1) stored here as (C_in, C_out)).
    x = jax.random.normal(kx, (B, embed_dim, H, W), dtype=jnp.float32)
    w = jax.random.normal(kw, (embed_dim, C_out), dtype=jnp.float32) * (1.0 / embed_dim ** 0.5)
    b = jax.random.normal(kb, (C_out,), dtype=jnp.float32) * 0.01

    out = patch_unembed(x, w, b, patch_size=patch_size, out_chans=out_chans)
    out = jax.block_until_ready(out)

    ref = _reference(x, w, b, patch_size=patch_size, out_chans=out_chans)
    assert out.shape == (B, out_chans, H * patch_size, W * patch_size)
    assert jnp.allclose(out, ref, atol=1e-4, rtol=1e-4)

    print("KERNEL_OK")
</pallas_src>

<mosaic_0001>
module attributes {stable_mosaic.version = 11 : i64} {
  func.func @_proj_kernel(%arg0: i32, %arg1: i32, %arg2: memref<1x32x64xf32, #tpu.memory_space<vmem>>, %arg3: memref<48x32xf32, #tpu.memory_space<vmem>>, %arg4: memref<48x1xf32, #tpu.memory_space<vmem>>, %arg5: memref<1x48x64xf32, #tpu.memory_space<vmem>>) attributes {dimension_semantics = [#tpu.dimension_semantics<parallel>, #tpu.dimension_semantics<parallel>], iteration_bounds = array<i64: 2, 1>, scalar_prefetch = 0 : i64, scratch_operands = 0 : i64, tpu.core_type = #tpu.core_type<tc>, window_params = [{transform_indices = @transform_0, window_bounds = array<i64: 1, 32, 64>}, {pipeline_mode = #tpu.pipeline_mode<synchronous>, transform_indices = @transform_1, window_bounds = array<i64: 48, 32>}, {pipeline_mode = #tpu.pipeline_mode<synchronous>, transform_indices = @transform_2, window_bounds = array<i64: 48, 1>}, {transform_indices = @transform_3, window_bounds = array<i64: 1, 48, 64>}]} {
    %c0 = arith.constant 0 : index
    %c0_0 = arith.constant 0 : index
    %0 = vector.load %arg3[%c0, %c0_0] : memref<48x32xf32, #tpu.memory_space<vmem>>, vector<48x32xf32>
    %c0_1 = arith.constant 0 : index
    %c0_2 = arith.constant 0 : index
    %c0_3 = arith.constant 0 : index
    %1 = vector.load %arg2[%c0_1, %c0_2, %c0_3] : memref<1x32x64xf32, #tpu.memory_space<vmem>>, vector<1x32x64xf32>
    %2 = vector.shape_cast %1 : vector<1x32x64xf32> to vector<32x64xf32>
    %cst = arith.constant dense<0.000000e+00> : vector<48x64xf32>
    %3 = tpu.matmul %0, %2, %cst {dimension_numbers = #tpu.dot_dimension_numbers<[1], [0], [0], [1], [0, 0, 1, 1], [], []>} : vector<48x32xf32>, vector<32x64xf32>, vector<48x64xf32> -> vector<48x64xf32>
    %c0_4 = arith.constant 0 : index
    %c0_5 = arith.constant 0 : index
    %4 = vector.load %arg4[%c0_4, %c0_5] : memref<48x1xf32, #tpu.memory_space<vmem>>, vector<48x1xf32>
    %5 = vector.broadcast %4 : vector<48x1xf32> to vector<48x64xf32>
    %6 = arith.addf %3, %5 : vector<48x64xf32>
    %c0_6 = arith.constant 0 : index
    %c0_7 = arith.constant 0 : index
    %c0_8 = arith.constant 0 : index
    %7 = vector.load %arg5[%c0_6, %c0_7, %c0_8] : memref<1x48x64xf32, #tpu.memory_space<vmem>>, vector<1x48x64xf32>
    %8 = vector.shape_cast %7 : vector<1x48x64xf32> to vector<48x64xf32>
    %9 = vector.shape_cast %6 : vector<48x64xf32> to vector<1x48x64xf32>
    tpu.vector_store %arg5[%c0_6, %c0_7, %c0_8], %9 {strides = array<i32>} : memref<1x48x64xf32, #tpu.memory_space<vmem>>, vector<1x48x64xf32>,
    return
  }
  func.func @transform_0(%arg0: i32, %arg1: i32) -> (i32, i32, i32) {
    %c0_i32 = arith.constant 0 : i32
    %c0_i32_0 = arith.constant 0 : i32
    return %arg0, %c0_i32, %arg1 : i32, i32, i32
  }
  func.func @transform_1(%arg0: i32, %arg1: i32) -> (i32, i32) {
    %c0_i32 = arith.constant 0 : i32
    %c0_i32_0 = arith.constant 0 : i32
    %c0_i32_1 = arith.constant 0 : i32
    return %c0_i32, %c0_i32_0 : i32, i32
  }
  func.func @transform_2(%arg0: i32, %arg1: i32) -> (i32, i32) {
    %c0_i32 = arith.constant 0 : i32
    %c0_i32_0 = arith.constant 0 : i32
    %c0_i32_1 = arith.constant 0 : i32
    return %c0_i32, %c0_i32_0 : i32, i32
  }
  func.func @transform_3(%arg0: i32, %arg1: i32) -> (i32, i32, i32) {
    %c0_i32 = arith.constant 0 : i32
    %c0_i32_0 = arith.constant 0 : i32
    return %arg0, %c0_i32, %arg1 : i32, i32, i32
  }
}

</mosaic_0001>

<bundles_post_ra>
// kernel: tpu_custom_call.1
= control target key start
LH: loop header
LB: loop body
LE: loop exit
PB: predicated region body
PF: predicated region fallthrough
CT: control target
= control target key end

     0   :  { %8 = vsyncpa [#allocation3], 0  ;;  %s740_s0 = inlined_call_operand.vmem [shape: f32[2,32,64], index: 0, kind: input, shape index: {}]   ;;  %s741_s1 = inlined_call_operand.vmem [shape: f32[48,32], index: 1, kind: input, shape index: {}]   ;;  %s742_s2 = inlined_call_operand.vmem [shape: f32[48,1], index: 2, kind: input, shape index: {}]   ;;  %s743_s3 = inlined_call_operand.hbm [shape: f32[2,48,64], index: 3, kind: output, shape index: {}]  }
   0x1   :  { %10 = vsyncpa [#allocation3 + $0x1], 0  ;;  %s591_s12 = smov 0   ;;  %s593_s13 = smov 0  }
   0x2   :  { %s595_s14 = smov 0   ;;  %s597_s15 = smov 0  }
   0x3   :  { %s599_s16 = smov 0   ;;  %s601_s17 = smov 0  }
   0x4 LB: > { %s396_s18 = sadd.s32 4294967295, %s566_s17   ;;  %s397_s19 = sadd.s32 4294967294, %s566_s17   ;;  %s566_s17 = sphi %s601_s17, %s16_s17   ;;  %s562_s16 = sphi %s599_s16, %s750_s16   ;;  %s558_s15 = sphi %s597_s15, %s749_s15   ;;  %s554_s14 = sphi %s595_s14, %s748_s14   ;;  %s550_s13 = sphi %s593_s13, %s747_s13   ;;  %s546_s12 = sphi %s591_s12, %s746_s12  }
   0x5   : > { %s28_s20 = sadd.s32 1, %s562_s16  ;;  %s107_s21 = sadd.s32 1, %s554_s14 }
   0x6   : > { %p30_p0 = scmp.ge.s32.totalorder %s28_s20, 2  ;;  %p117_p1 = scmp.ne.s32.totalorder %s554_s14, %s550_s13 }
   0x7   : > { %p118_p2 = scmp.eq.s32.totalorder %s396_s18, 1  ;;  %p123_p3 = scmp.ne.s32.totalorder %s550_s13, %s546_s12 }
   0x8   : > { %s752_s20 = smov (%p30_p0, %s28_s20), 0  ;;  %p124_p5 = scmp.eq.s32.totalorder %s397_s19, 1 }
   0x9   : > { %p631_p4 = por %p118_p2, %p117_p1  ;;  %s102_s23 = ssub.s32 %s562_s16, %s752_s20 }
   0xa   : > { %p400_p6 = scmp.ge.s32.totalorder %s566_s17, 1  ;;  %p105_p7 = scmp.eq.s32.totalorder %s102_s23, 0 }
   0xb   : > { %p638_p8 = por %p124_p5, %p123_p3  ;;  %p159_p9 = scmp.lt.s32.totalorder %s566_s17, 3 }
   0xc   : > { %s644_s25 = scalar_select %p105_p7, %s554_s14, %s107_s21  }
   0xd   : > { %p160_p10 = pnand %p400_p6, %p159_p9 }
   0xe   : > { %p186_p11 = scmp.lt.s32.totalorder (!%p160_p10), %s558_s15, 1  ;;  %s183_s11 = sand.u32 (!%p160_p10), 1, %s550_s13  }
   0xf   : > { %163 = sbr.rel (%p160_p10) target bundleno = 179 (0xb3), region = 32  ;;  %s302_s29 = scalar_lea.sflag (!%p160_p10), [#allocation3], %s183_s11 }
  0x10   : > { %s425_s18 = smul.u32 (!%p160_p10), 48, %s183_s11  ;;  %s508_s7 = scalar_lea.hbm (!%p160_p10), %s743_s3, 96 }
  0x11   : > { %s426_s21 = smul.u32 (!%p160_p10), 48, %s558_s15 }
  0x12   : > { %s185_s19 = scalar_lea.vmem (!%p160_p10), [#allocation2], %s425_s18 }
  0x13   : > { %s314_s27 = scalar_lea.hbm (!%p160_p10), %s743_s3, %s426_s21  ;;  %s315_s28 = sshll.u32 (!%p160_p10), %s185_s19, 4  ;;  %s316_s28 = int_to_ptr.vmem [resolvable:$true] %s315_s28 }
  0x14   : > { %v568_v0 = vmov 0   ;;  %s187_s26 = scalar_select %p186_p11, %s558_s15, 1  ;;  %v206_v1 = vld [vmem:[%s742_s2 + $0x10] sm:$0xff]  ;;  %v204_v2 = vld [vmem:[%s742_s2] sm:$0xff]  ;;  %v195_v8 = vld [vmem:[%s741_s1 + $0x8] sm:$0xff]  ;;  %vm240_vm0 = vcmask 261120  }
  0x15   : > { %486 = vset.pattern.permute.xlu1 %v568_v0  ;;  %485 = vset.pattern.permute.xlu0 %v568_v0  ;;  %v208_v3 = vld [vmem:[%s742_s2 + $0x20] sm:$0xff]  ;;  %v197_v9 = vld [vmem:[%s741_s1 + $0x18] sm:$0xff]  ;;  %v205_v13 = vld [vmem:[%s742_s2 + $0x8] sm:$0xff]  ;;  %vm294_vm1 = vcmask 523264   ;;  %s317_s15 = sshll.u32 %s314_s27, 4  ;;  %s318_s15 = int_to_ptr.hbm [resolvable:$true] %s317_s15 }
  0x16   : > { %487 = vset.pattern.permute.xlu2 %v568_v0  ;;  %222 = vperm.xlu1 %486, %v206_v1   ;;  %s412_s6 = sshll.u32 %s187_s26, 5  ;;  %v198_v10 = vld [vmem:[%s741_s1 + $0x20] sm:$0xff]  ;;  %v207_v11 = vld [vmem:[%s742_s2 + $0x18] sm:$0xff]  ;;  %v209_v14 = vld [vmem:[%s742_s2 + $0x28] sm:$0xff]  ;;  %s502_s30 = sshra.s32 %s318_s15, 4  ;;  %s503_s30 = int_to_ptr.hbm [resolvable:$true] %s502_s30 }
  0x17   : > { %212 = vperm.xlu0 %485, %v204_v2   ;;  %232 = vperm.xlu2 %487, %v208_v3   ;;  %s193_s9 = scalar_lea.vmem %s740_s0, %s412_s6  ;;  %v194_v12 = vld [vmem:[%s741_s1] sm:$0xff]  ;;  %v196_v15 = vld [vmem:[%s741_s1 + $0x10] sm:$0xff]  ;;  %v199_v16 = vld [vmem:[%s741_s1 + $0x28] sm:$0xff]  ;;  %s504_s4 = scalar_lea.hbm %s503_s30, 48 }
  0x18   : > { %v203_v4 = vld [vmem:[%s193_s9 + $0x18] sm:$0xff]  ;;  %v202_v5 = vld [vmem:[%s193_s9 + $0x10] sm:$0xff]  ;;  %v201_v6 = vld [vmem:[%s193_s9 + $0x8] sm:$0xff]  ;;  %p505_p12 = scmp.ne.s32.totalorder %s503_s30, %s504_s4  ;;  %p509_p1 = scmp.lt.s32.totalorder %s503_s30, %s743_s3 }
  0x19   : > { %413 = vmatpush.msra.mxu1 %v203_v4  ;;  %414 = vmatpush.msra.mxu2 %v203_v4  ;;  %v200_v7 = vld [vmem:[%s193_s9] sm:$0xff]  ;;  %p510_p2 = scmp.lt.s32.totalorder %s508_s7, %s504_s4 }
  0x1a   : > { %415 = vmatpush.msra.mxu3 %v203_v4  ;;  %271 = vmatpush.msra.mxu0 %v203_v4  ;;  %p506_p13 = pnand %p505_p12, %p631_p4 }
  0x1b   : > { %416 = vmatpush.msra.mxu1 %v202_v5  ;;  %417 = vmatpush.msra.mxu2 %v202_v5  ;;  %p511_p3 = por %p510_p2, %p509_p1 }
  0x1c   : > { %418 = vmatpush.msra.mxu3 %v202_v5  ;;  %272 = vmatpush.msra.mxu0 %v202_v5  ;;  %p507_p0 = pneg %p506_p13 }
  0x1d   : > { %419 = vmatpush.msra.mxu1 %v201_v6  ;;  %420 = vmatpush.msra.mxu2 %v201_v6 }
  0x1e   : > { %421 = vmatpush.msra.mxu3 %v201_v6  ;;  %273 = vmatpush.msra.mxu0 %v201_v6  ;;  %p512_p5 = pnand %p511_p3, %p507_p0 }
  0x1f   : > { %422 = vmatpush.msra.mxu1 %v200_v7  ;;  %423 = vmatpush.msra.mxu2 %v200_v7 }
  0x20   : > { %424 = vmatpush.msra.mxu3 %v200_v7  ;;  %404 = vmatmul.msk.f32.vlgmr.msra.gmra.mxu1 %vm240_vm0, %v195_v8 }
  0x21   : > { %406 = vmatmul.msk.f32.vlgmr.msra.gmra.mxu2 %vm240_vm0, %v197_v9  ;;  %407 = vmatmul.msk.f32.vlgmr.msra.gmra.mxu3 %vm240_vm0, %v198_v10 }
  0x22   : > { %274 = vmatpush.msra.mxu0 %v200_v7  ;;  %227 = vperm.xlu1 %486, %v207_v11  }
  0x23   : > { %403 = vmatmul.msk.f32.vlgmr.msra.gmra.mxu0 %vm240_vm0, %v194_v12  ;;  %217 = vperm.xlu0 %485, %v205_v13  }
  0x24   : > { %237 = vperm.xlu2 %487, %v209_v14  }
  0x28   : > { %405 = vmatmul.msk.f32.gmra.mxu1 %vm240_vm0, %v196_v15 }
  0x29   : > { %408 = vmatmul.msk.f32.gmra.mxu3 %vm240_vm0, %v199_v16 }
  0x71   : > { %v233_v24 = vpop.permute.xlu2 %232 }
  0x7e   : > { %v238_v32 = vpop.permute.xlu2 %237 }
  0x88   : > { %v223_v18 = vpop.permute.xlu1 %222 }
  0x89   : > { %v213_v17 = vpop.permute.xlu0 %212 }
  0x94   : > { %v228_v25 = vpop.permute.xlu1 %227 }
  0x95   : > { %v218_v19 = vpop.permute.xlu0 %217 }
  0x9d   : > { %v279_v20 = vpop.f32.mrf.mxu1 }
  0x9e   : > { %v280_v21 = vadd.f32 %v279_v20, %v218_v19 }
  0xa0   : > { %296 = vst.msk [vmem:[%s185_s19 + $0x8] sm:$0xff] %vm294_vm1, %v280_v21  ;;  %v276_v22 = vpop.f32.mrf.mxu0 }
  0xa1   : > { %v277_v23 = vadd.f32 %v276_v22, %v213_v17 }
  0xa3   : > { %295 = vst.msk [vmem:[%s185_s19] sm:$0xff] %vm294_vm1, %v277_v23 }
  0xa4   : > { %v285_v26 = vpop.f32.mrf.mxu2  ;;  %v288_v27 = vpop.f32.mrf.mxu3 }
  0xa5   : > { %v286_v28 = vadd.f32 %v285_v26, %v228_v25  ;;  %v289_v29 = vadd.f32 %v288_v27, %v233_v24  ;;  %v282_v30 = vpop.f32.mrf.mxu1 }
  0xa6   : > { %v283_v31 = vadd.f32 %v282_v30, %v223_v18 }
  0xa7   : > { %298 = vst.msk [vmem:[%s185_s19 + $0x18] sm:$0xff] %vm294_vm1, %v286_v28 }
  0xa8   : > { %299 = vst.msk [vmem:[%s185_s19 + $0x20] sm:$0xff] %vm294_vm1, %v289_v29 }
  0xa9   : > { %297 = vst.msk [vmem:[%s185_s19 + $0x10] sm:$0xff] %vm294_vm1, %v283_v31 }
  0xac   : > { %v291_v33 = vpop.f32.mrf.mxu3 }
  0xad   : > { %v292_v34 = vadd.f32 %v291_v33, %v238_v32 }
  0xaf   : > { %300 = vst.msk [vmem:[%s185_s19 + $0x28] sm:$0xff] %vm294_vm1, %v292_v34 }
  0xb0   : > { %515 = shalt.err (!%p512_p5)
}
  0xb1   : > { %s569_s10 = smov 128   ;;  %s570_s11 = smov 8  }
  0xb2   : > { %427 = dma.vmem_to_hbm [thread:$0]  (%p631_p4), %s316_s28, 768, %s318_s15, %s302_s29, %s569_s10, %s569_s10, %s570_s11  }
  0xb3 PF: > { %p433_p6 = scmp.ge.s32.totalorder %s566_s17, 2  ;;  %s332_s18 = sand.u32 1, %s546_s12  }
  0xb4   : > { %s333_s19 = scalar_lea.sflag [#allocation3], %s332_s18 }
  0xb5   : > { %p430_p7 = pnand %p433_p6, %p638_p8 }
  0xb7   : > { %p431_p9 = pneg %p430_p7 }
  0xb9   : > { %541 = dma.done.wait (%p431_p9), %s333_s19, 768  }
  0xba   : > { %543 = vsyncadd (%p431_p9), %s333_s19, 4294966528  ;;  %s16_s17 = sadd.s32 1, %s566_s17   ;;  %s746_s12 = smov %s550_s13 }
  0xbb   : > { %p13_p10 = scmp.ge.s32.totalorder %s16_s17, 4   ;;  %s747_s13 = smov %s554_s14 }
  0xbc   : > { %s748_s14 = smov %s644_s25  ;;  %s749_s15 = smov %s562_s16 }
  0xbd   : > { %s750_s16 = smov %s752_s20  ;;  %15 = sbr.rel (!%p13_p10) target bundleno = 4 (0x4), region = 67 }
  0xc2   :  { %339 = vsyncpa [#allocation3], 1 }
  0xc3   :  { %341 = vsyncpa [#allocation3 + $0x1], 1 }

</bundles_post_ra>
